<compile_context>
chip_gen: v5e
topology: v5e:2x2
jax: 0.10.0
libtpu: 0.0.40
codegen_flags: <defaults>
</compile_context>

<pallas_src>
import functools
from math import sqrt

import jax
import jax.numpy as jnp
from jax import lax
from jax.experimental import pallas as pl
from jax.experimental.pallas import tpu as pltpu


def _attention_head_kernel(x_ref, wqkv_ref, bqkv_ref, mk_ref, mq_ref,
                           o_ref, qkv_ref, *,
                           hidden_pad, q_tile, is_decoder, apply_mask):
    """Grid = (batch, num_q_tiles).

    x_ref    : (S, E)      full sequence for the current batch element
    wqkv_ref : (E, 3*Hp)   fused, zero-padded [Wq*scale | Wk | Wv]^T (compute dtype)
    bqkv_ref : (1, 3*Hp)   fused, zero-padded bias (f32; q-part pre-scaled)
    mk_ref   : (1, S)      key-side attention mask
    mq_ref   : (tq, 1)     query-side attention mask for this query tile
    o_ref    : (tq, Hp)    output tile (lane-dense: Hp is a multiple of 128)
    qkv_ref  : (S, 3*Hp)   VMEM scratch; fused projection computed once per
                           batch element (q_idx == 0) and reused by all tiles.
    """
    q_idx = pl.program_id(1)
    Hp = hidden_pad

    # ---- fused QKV projection, once per batch element -------------------
    @pl.when(q_idx == 0)
    def _():
        qkv = jnp.dot(x_ref[...], wqkv_ref[...],
                      preferred_element_type=jnp.float32)
        qkv = qkv + bqkv_ref[...]
        qkv_ref[...] = qkv.astype(qkv_ref.dtype)

    q_start = pl.multiple_of(q_idx * q_tile, q_tile)
    q = qkv_ref[pl.ds(q_start, q_tile), 0:Hp]          # (tq, Hp), already scaled
    k = qkv_ref[:, Hp:2 * Hp]                          # (S,  Hp)
    v = qkv_ref[:, 2 * Hp:3 * Hp]                      # (S,  Hp)

    # q @ k^T without materializing a transpose: contract on the hidden dim.
    scores = lax.dot_general(q, k, (((1,), (1,)), ((), ())),
                             preferred_element_type=jnp.float32)   # (tq, S)

    if apply_mask:
        mq = mq_ref[...] > 0.5          # (tq, 1) bool
        mk = mk_ref[...] > 0.5          # (1,  S) bool
        allowed = jnp.logical_and(mq, mk)
        if is_decoder:
            S = k.shape[0]
            row = lax.broadcasted_iota(jnp.int32, (q_tile, S), 0) + q_start
            col = lax.broadcasted_iota(jnp.int32, (q_tile, S), 1)
            allowed = jnp.logical_and(allowed, row >= col)
        # pad-query/pad-key pairs stay unmasked (coupling == 0 in the reference).
        pad_pair = jnp.logical_and(jnp.logical_not(mq), jnp.logical_not(mk))
        allowed = jnp.logical_or(allowed, pad_pair)
        scores = jnp.where(allowed, scores, scores - 100000.0)

    # Softmax along keys, f32 throughout (VPU/EUP).
    s_max = jnp.max(scores, axis=-1, keepdims=True)
    e = jnp.exp(scores - s_max)
    denom = jnp.sum(e, axis=-1, keepdims=True)
    weights = e * pl.reciprocal(denom, approx=True)

    out = jnp.dot(weights.astype(v.dtype), v,
                  preferred_element_type=jnp.float32)              # (tq, Hp)
    o_ref[...] = out.astype(o_ref.dtype)


def attention_head_forward(hidden_state, wq, bq, wk, bk, wv, bv,
                           attention_masks=None, *, is_decoder=False,
                           compute_dtype=jnp.bfloat16, q_tile=None):
    """hidden_state: (B, S, E); w*: (H, E) PyTorch layout; b*: (H,)."""
    B, S, E = hidden_state.shape
    H = wq.shape[0]
    Hp = -(-H // 128) * 128            # pad hidden to a lane-dense multiple of 128
    scale = 1.0 / sqrt(H)

    # Fused, zero-padded (E, 3*Hp) weight and (1, 3*Hp) bias.  The 1/sqrt(H)
    # scale is folded into the q weights/bias here (tiny one-off wrapper glue),
    # so the kernel never touches it.  Zero-padded columns contribute 0 to
    # q@k^T and produce 0 output columns that the wrapper slices off.
    def pad_wt(w, s=1.0):              # (H, E) -> (E, Hp)
        return jnp.pad(w.T.astype(jnp.float32) * s, ((0, 0), (0, Hp - H)))

    def pad_b(b, s=1.0):
        return jnp.pad(b.astype(jnp.float32) * s, (0, Hp - H))

    w_qkv = jnp.concatenate([pad_wt(wq, scale), pad_wt(wk), pad_wt(wv)],
                            axis=1).astype(compute_dtype)
    b_qkv = jnp.concatenate([pad_b(bq, scale), pad_b(bk), pad_b(bv)]
                            ).reshape(1, 3 * Hp)

    apply_mask = attention_masks is not None
    if attention_masks is None:
        attention_masks = jnp.ones((B, S), dtype=jnp.float32)
    m = attention_masks.astype(jnp.float32)
    mask_k = m.reshape(B, 1, S)
    mask_q = m.reshape(B, S, 1)

    if q_tile is None:
        q_tile = next((t for t in (256, 128) if S % t == 0), S)
    assert S % q_tile == 0

    kernel = functools.partial(
        _attention_head_kernel,
        hidden_pad=Hp, q_tile=q_tile,
        is_decoder=is_decoder, apply_mask=apply_mask)

    grid_spec = pltpu.PrefetchScalarGridSpec(
        num_scalar_prefetch=0,
        grid=(B, S // q_tile),
        in_specs=[
            pl.BlockSpec((None, S, E), lambda b, q: (b, 0, 0)),       # x (full seq)
            pl.BlockSpec((E, 3 * Hp), lambda b, q: (0, 0)),           # fused Wqkv^T
            pl.BlockSpec((1, 3 * Hp), lambda b, q: (0, 0)),           # fused bias
            pl.BlockSpec((None, 1, S), lambda b, q: (b, 0, 0)),       # key mask
            pl.BlockSpec((None, q_tile, 1), lambda b, q: (b, q, 0)),  # query mask
        ],
        out_specs=pl.BlockSpec((None, q_tile, Hp), lambda b, q: (b, q, 0)),
        scratch_shapes=[pltpu.VMEM((S, 3 * Hp), compute_dtype)],
    )

    out_padded = pl.pallas_call(
        kernel,
        out_shape=jax.ShapeDtypeStruct((B, S, Hp), jnp.float32),
        grid_spec=grid_spec,
        compiler_params=pltpu.CompilerParams(
            # Batch is parallel (megacore on v7x); query-tile axis is arbitrary
            # because the fused QKV scratch is carried across query tiles.
            dimension_semantics=("parallel", "arbitrary")),
    )(hidden_state.astype(compute_dtype), w_qkv, b_qkv, mask_k, mask_q)

    return out_padded[:, :, :H]


def _reference_forward(x, wq, bq, wk, bk, wv, bv, mask, is_decoder):
    """Plain-JAX f32 reference mirroring the PyTorch module (for validation)."""
    q = x @ wq.T + bq
    k = x @ wk.T + bk
    v = x @ wv.T + bv
    scores = jnp.einsum("bsh,bth->bst", q, k) / sqrt(q.shape[-1])
    if mask is not None:
        attn_mat = mask[:, :, None] * mask[:, None, :]
        pad = 1.0 - mask
        pad_mat = pad[:, :, None] * pad[:, None, :]
        if is_decoder:
            attn_mat = jnp.tril(attn_mat)
        coupling = 1.0 - attn_mat - pad_mat
        scores = scores + coupling * (-100000.0)
    w = jax.nn.softmax(scores, axis=-1)
    return jnp.einsum("bst,bth->bsh", w, v)


if __name__ == "__main__":
    B, S, E, H = 2, 8, 32, 32
    is_decoder = True

    key = jax.random.PRNGKey(0)
    kx, kmq, kbq, kmk, kbk, kmv, kbv, km = jax.random.split(key, 8)

    # Deterministic PyTorch-style Linear init: U(-1/sqrt(E), 1/sqrt(E)).
    bound = 1.0 / sqrt(E)
    x = jax.random.normal(kx, (B, S, E), dtype=jnp.float32)
    wq = jax.random.uniform(kmq, (H, E), minval=-bound, maxval=bound, dtype=jnp.float32)
    bq = jax.random.uniform(kbq, (H,), minval=-bound, maxval=bound, dtype=jnp.float32)
    wk = jax.random.uniform(kmk, (H, E), minval=-bound, maxval=bound, dtype=jnp.float32)
    bk = jax.random.uniform(kbk, (H,), minval=-bound, maxval=bound, dtype=jnp.float32)
    wv = jax.random.uniform(kmv, (H, E), minval=-bound, maxval=bound, dtype=jnp.float32)
    bv = jax.random.uniform(kbv, (H,), minval=-bound, maxval=bound, dtype=jnp.float32)

    # Padding mask: 1 for real tokens, 0 for padding (last 2 tokens of batch 1 padded).
    mask = jnp.ones((B, S), dtype=jnp.float32)
    mask = mask.at[1, S - 2:].set(0.0)

    ref = _reference_forward(x, wq, bq, wk, bk, wv, bv, mask, is_decoder)

    # f32 compute path (tight check; approx reciprocal is the only deviation).
    out_f32 = attention_head_forward(x, wq, bq, wk, bk, wv, bv,
                                     attention_masks=mask,
                                     is_decoder=is_decoder,
                                     compute_dtype=jnp.float32)
    out_f32 = jax.block_until_ready(out_f32)
    assert out_f32.shape == (B, S, H)
    assert jnp.allclose(out_f32, ref, atol=3e-3, rtol=3e-3)

    # bf16 MXU path (default, f32 accumulation + f32 softmax; looser check).
    out_bf16 = attention_head_forward(x, wq, bq, wk, bk, wv, bv,
                                      attention_masks=mask,
                                      is_decoder=is_decoder,
                                      compute_dtype=jnp.bfloat16)
    out_bf16 = jax.block_until_ready(out_bf16)
    assert out_bf16.shape == (B, S, H)
    assert jnp.allclose(out_bf16, ref, atol=3e-2, rtol=3e-2)

    print("KERNEL_OK")
</pallas_src>

<mosaic_0001>
module attributes {stable_mosaic.version = 11 : i64} {
  func.func @_attention_head_kernel(%arg0: i32, %arg1: i32, %arg2: memref<1x8x32xf32, #tpu.memory_space<vmem>>, %arg3: memref<32x384xf32, #tpu.memory_space<vmem>>, %arg4: memref<1x384xf32, #tpu.memory_space<vmem>>, %arg5: memref<1x1x8xf32, #tpu.memory_space<vmem>>, %arg6: memref<1x8x1xf32, #tpu.memory_space<vmem>>, %arg7: memref<1x8x128xf32, #tpu.memory_space<vmem>>, %arg8: memref<8x384xf32, #tpu.memory_space<vmem>>) attributes {dimension_semantics = [#tpu.dimension_semantics<parallel>, #tpu.dimension_semantics<arbitrary>], iteration_bounds = array<i64: 2, 1>, scalar_prefetch = 0 : i64, scratch_operands = 1 : i64, tpu.core_type = #tpu.core_type<tc>, window_params = [{transform_indices = @transform_0, window_bounds = array<i64: 1, 8, 32>}, {pipeline_mode = #tpu.pipeline_mode<synchronous>, transform_indices = @transform_1, window_bounds = array<i64: 32, 384>}, {pipeline_mode = #tpu.pipeline_mode<synchronous>, transform_indices = @transform_2, window_bounds = array<i64: 1, 384>}, {transform_indices = @transform_3, window_bounds = array<i64: 1, 1, 8>}, {transform_indices = @transform_4, window_bounds = array<i64: 1, 8, 1>}, {transform_indices = @transform_5, window_bounds = array<i64: 1, 8, 128>}]} {
    %c0_i32 = arith.constant 0 : i32
    %0 = arith.cmpi eq, %arg1, %c0_i32 : i32
    %1 = arith.extui %0 : i1 to i32
    %c0_i32_0 = arith.constant 0 : i32
    %2 = arith.cmpi ne, %1, %c0_i32_0 : i32
    scf.if %2 {
      %c0_20 = arith.constant 0 : index
      %c0_21 = arith.constant 0 : index
      %c0_22 = arith.constant 0 : index
      %50 = vector.load %arg2[%c0_20, %c0_21, %c0_22] : memref<1x8x32xf32, #tpu.memory_space<vmem>>, vector<1x8x32xf32>
      %51 = vector.shape_cast %50 : vector<1x8x32xf32> to vector<8x32xf32>
      %c0_23 = arith.constant 0 : index
      %c0_24 = arith.constant 0 : index
      %52 = vector.load %arg3[%c0_23, %c0_24] : memref<32x384xf32, #tpu.memory_space<vmem>>, vector<32x384xf32>
      %cst_25 = arith.constant dense<0.000000e+00> : vector<8x384xf32>
      %53 = tpu.matmul %51, %52, %cst_25 {dimension_numbers = #tpu.dot_dimension_numbers<[1], [0], [0], [1], [0, 0, 1, 1], [], []>} : vector<8x32xf32>, vector<32x384xf32>, vector<8x384xf32> -> vector<8x384xf32>
      %c0_26 = arith.constant 0 : index
      %c0_27 = arith.constant 0 : index
      %54 = vector.load %arg4[%c0_26, %c0_27] : memref<1x384xf32, #tpu.memory_space<vmem>>, vector<1x384xf32>
      %55 = vector.broadcast %54 : vector<1x384xf32> to vector<8x384xf32>
      %56 = arith.addf %53, %55 : vector<8x384xf32>
      %c0_28 = arith.constant 0 : index
      %c0_29 = arith.constant 0 : index
      %57 = vector.load %arg8[%c0_28, %c0_29] : memref<8x384xf32, #tpu.memory_space<vmem>>, vector<8x384xf32>
      tpu.vector_store %arg8[%c0_28, %c0_29], %56 {strides = array<i32>} : memref<8x384xf32, #tpu.memory_space<vmem>>, vector<8x384xf32>,
    } else {
    }
    %c8_i32 = arith.constant 8 : i32
    %3 = arith.muli %arg1, %c8_i32 : i32
    %4 = tpu.assume_multiple %3, 8 : i32
    %5 = arith.index_cast %4 : i32 to index
    %c0 = arith.constant 0 : index
    %6 = vector.load %arg8[%5, %c0] : memref<8x384xf32, #tpu.memory_space<vmem>>, vector<8x128xf32>
    %c0_1 = arith.constant 0 : index
    %c128 = arith.constant 128 : index
    %7 = vector.load %arg8[%c0_1, %c128] : memref<8x384xf32, #tpu.memory_space<vmem>>, vector<8x128xf32>
    %c0_2 = arith.constant 0 : index
    %c256 = arith.constant 256 : index
    %8 = vector.load %arg8[%c0_2, %c256] : memref<8x384xf32, #tpu.memory_space<vmem>>, vector<8x128xf32>
    %cst = arith.constant dense<0.000000e+00> : vector<8x8xf32>
    %9 = tpu.matmul %6, %7, %cst {dimension_numbers = #tpu.dot_dimension_numbers<[1], [1], [0], [0], [0, 0, 1, 0], [], []>} : vector<8x128xf32>, vector<8x128xf32>, vector<8x8xf32> -> vector<8x8xf32>
    %c0_3 = arith.constant 0 : index
    %c0_4 = arith.constant 0 : index
    %c0_5 = arith.constant 0 : index
    %10 = vector.load %arg6[%c0_3, %c0_4, %c0_5] : memref<1x8x1xf32, #tpu.memory_space<vmem>>, vector<1x8x1xf32>
    %11 = vector.shape_cast %10 : vector<1x8x1xf32> to vector<8x1xf32>
    %cst_6 = arith.constant 5.000000e-01 : f32
    %12 = vector.broadcast %cst_6 : f32 to vector<8x1xf32>
    %13 = arith.cmpf ogt, %11, %12 : vector<8x1xf32>
    %c0_7 = arith.constant 0 : index
    %c0_8 = arith.constant 0 : index
    %c0_9 = arith.constant 0 : index
    %14 = vector.load %arg5[%c0_7, %c0_8, %c0_9] : memref<1x1x8xf32, #tpu.memory_space<vmem>>, vector<1x1x8xf32>
    %15 = vector.shape_cast %14 : vector<1x1x8xf32> to vector<1x8xf32>
    %cst_10 = arith.constant 5.000000e-01 : f32
    %16 = vector.broadcast %cst_10 : f32 to vector<1x8xf32>
    %17 = arith.cmpf ogt, %15, %16 : vector<1x8xf32>
    %18 = vector.broadcast %13 : vector<8x1xi1> to vector<8x8xi1>
    %19 = vector.broadcast %17 : vector<1x8xi1> to vector<8x8xi1>
    %20 = arith.andi %18, %19 : vector<8x8xi1>
    %21 = tpu.iota {dimensions = array<i32: 0>} : vector<8x8xi32>
    %22 = vector.broadcast %4 : i32 to vector<8x8xi32>
    %23 = arith.addi %21, %22 : vector<8x8xi32>
    %24 = tpu.iota {dimensions = array<i32: 1>} : vector<8x8xi32>
    %25 = arith.cmpi sge, %23, %24 : vector<8x8xi32>
    %26 = arith.andi %20, %25 : vector<8x8xi1>
    %cst_11 = arith.constant dense<true> : vector<8x1xi1>
    %27 = arith.xori %13, %cst_11 : vector<8x1xi1>
    %cst_12 = arith.constant dense<true> : vector<1x8xi1>
    %28 = arith.xori %17, %cst_12 : vector<1x8xi1>
    %29 = vector.broadcast %27 : vector<8x1xi1> to vector<8x8xi1>
    %30 = vector.broadcast %28 : vector<1x8xi1> to vector<8x8xi1>
    %31 = arith.andi %29, %30 : vector<8x8xi1>
    %32 = arith.ori %26, %31 : vector<8x8xi1>
    %cst_13 = arith.constant 1.000000e+05 : f32
    %33 = vector.broadcast %cst_13 : f32 to vector<8x8xf32>
    %34 = arith.subf %9, %33 : vector<8x8xf32>
    %35 = arith.select %32, %9, %34 : vector<8x8xi1>, vector<8x8xf32>
    %cst_14 = arith.constant dense<0xFF800000> : vector<8xf32>
    %36 = vector.multi_reduction <maximumf>, %35, %cst_14 [1] : vector<8x8xf32> to vector<8xf32>
    %37 = vector.shape_cast %36 : vector<8xf32> to vector<8x1xf32>
    %38 = vector.broadcast %37 : vector<8x1xf32> to vector<8x8xf32>
    %39 = arith.subf %35, %38 : vector<8x8xf32>
    %40 = math.exp %39 : vector<8x8xf32>
    %cst_15 = arith.constant dense<0.000000e+00> : vector<8xf32>
    %41 = vector.multi_reduction <add>, %40, %cst_15 [1] : vector<8x8xf32> to vector<8xf32>
    %42 = vector.shape_cast %41 : vector<8xf32> to vector<8x1xf32>
    %43 = tpu.reciprocal %42 {approx = true} : vector<8x1xf32> -> vector<8x1xf32>
    %44 = vector.broadcast %43 : vector<8x1xf32> to vector<8x8xf32>
    %45 = arith.mulf %40, %44 : vector<8x8xf32>
    %cst_16 = arith.constant dense<0.000000e+00> : vector<8x128xf32>
    %46 = tpu.matmul %45, %8, %cst_16 {dimension_numbers = #tpu.dot_dimension_numbers<[1], [0], [0], [1], [0, 0, 1, 1], [], []>} : vector<8x8xf32>, vector<8x128xf32>, vector<8x128xf32> -> vector<8x128xf32>
    %c0_17 = arith.constant 0 : index
    %c0_18 = arith.constant 0 : index
    %c0_19 = arith.constant 0 : index
    %47 = vector.load %arg7[%c0_17, %c0_18, %c0_19] : memref<1x8x128xf32, #tpu.memory_space<vmem>>, vector<1x8x128xf32>
    %48 = vector.shape_cast %47 : vector<1x8x128xf32> to vector<8x128xf32>
    %49 = vector.shape_cast %46 : vector<8x128xf32> to vector<1x8x128xf32>
    tpu.vector_store %arg7[%c0_17, %c0_18, %c0_19], %49 {strides = array<i32>} : memref<1x8x128xf32, #tpu.memory_space<vmem>>, vector<1x8x128xf32>,
    return
  }
  func.func @transform_0(%arg0: i32, %arg1: i32) -> (i32, i32, i32) {
    %c0_i32 = arith.constant 0 : i32
    %c0_i32_0 = arith.constant 0 : i32
    %c0_i32_1 = arith.constant 0 : i32
    return %arg0, %c0_i32, %c0_i32_0 : i32, i32, i32
  }
  func.func @transform_1(%arg0: i32, %arg1: i32) -> (i32, i32) {
    %c0_i32 = arith.constant 0 : i32
    %c0_i32_0 = arith.constant 0 : i32
    %c0_i32_1 = arith.constant 0 : i32
    return %c0_i32, %c0_i32_0 : i32, i32
  }
  func.func @transform_2(%arg0: i32, %arg1: i32) -> (i32, i32) {
    %c0_i32 = arith.constant 0 : i32
    %c0_i32_0 = arith.constant 0 : i32
    %c0_i32_1 = arith.constant 0 : i32
    return %c0_i32, %c0_i32_0 : i32, i32
  }
  func.func @transform_3(%arg0: i32, %arg1: i32) -> (i32, i32, i32) {
    %c0_i32 = arith.constant 0 : i32
    %c0_i32_0 = arith.constant 0 : i32
    %c0_i32_1 = arith.constant 0 : i32
    return %arg0, %c0_i32, %c0_i32_0 : i32, i32, i32
  }
  func.func @transform_4(%arg0: i32, %arg1: i32) -> (i32, i32, i32) {
    %c0_i32 = arith.constant 0 : i32
    %c0_i32_0 = arith.constant 0 : i32
    return %arg0, %arg1, %c0_i32 : i32, i32, i32
  }
  func.func @transform_5(%arg0: i32, %arg1: i32) -> (i32, i32, i32) {
    %c0_i32 = arith.constant 0 : i32
    %c0_i32_0 = arith.constant 0 : i32
    return %arg0, %arg1, %c0_i32 : i32, i32, i32
  }
}

</mosaic_0001>

<bundles_post_ra>
// kernel: tpu_custom_call.1
= control target key start
LH: loop header
LB: loop body
LE: loop exit
PB: predicated region body
PF: predicated region fallthrough
CT: control target
= control target key end

     0   :  { %10 = vsyncpa [#allocation4], 0  ;;  %s1088_s0 = inlined_call_operand.vmem [shape: f32[2,8,32], index: 0, kind: input, shape index: {}]   ;;  %s1089_s1 = inlined_call_operand.hbm [shape: f32[32,384], index: 1, kind: input, shape index: {}]   ;;  %s1090_s2 = inlined_call_operand.vmem [shape: f32[1,384], index: 2, kind: input, shape index: {}]   ;;  %s1091_s3 = inlined_call_operand.hbm [shape: f32[2,1,8], index: 3, kind: input, shape index: {}]   ;;  %s1092_s4 = inlined_call_operand.vmem [shape: f32[2,8,1], index: 4, kind: input, shape index: {}]   ;;  %s1093_s5 = inlined_call_operand.hbm [shape: f32[2,8,128], index: 5, kind: output, shape index: {}]  }
   0x1   :  { %11 = vsyncpa [#allocation7], 0 }
   0x2   :  { %13 = vsyncpa [#allocation7 + $0x1], 0 }
   0x3   :  { %14 = vsyncpa [#allocation5], 0 }
   0x4   :  { %16 = vsyncpa [#allocation5 + $0x1], 0  ;;  %s923_s18 = smov 0   ;;  %s925_s19 = smov 0  }
   0x5   :  { %s927_s20 = smov 0   ;;  %s929_s21 = smov 0  }
   0x6   :  { %s931_s22 = smov 0   ;;  %s933_s23 = smov 0  }
   0x7 LB: > { %s639_s24 = sadd.s32 4294967295, %s886_s23   ;;  %p641_p0 = scmp.ge.s32.totalorder %s886_s23, 1  ;;  %s886_s23 = sphi %s933_s23, %s22_s23   ;;  %s882_s22 = sphi %s931_s22, %s1104_s22   ;;  %s878_s21 = sphi %s929_s21, %s1103_s21   ;;  %s874_s20 = sphi %s927_s20, %s1102_s20   ;;  %s870_s19 = sphi %s925_s19, %s1101_s19   ;;  %s866_s18 = sphi %s923_s18, %s1100_s18  }
   0x8   : > { %p955_p1 = scmp.eq.s32.totalorder %s639_s24, 0  ;;  %p189_p2 = scmp.lt.s32.totalorder %s886_s23, 3 }
   0x9   : > { %s200_s28 = sshll.u32 %s1089_s1, 4  ;;  %s888_s30 = smov [#allocation3]   ;;  %s201_s28 = int_to_ptr.hbm [resolvable:$true] %s200_s28 }
   0xa   : > { %p963_p3 = pnand %p641_p0, %p189_p2  ;;  %s202_s6 = sshll.u32 %s888_s30, 4  ;;  %s203_s6 = int_to_ptr.vmem [resolvable:$true] %s202_s6 }
   0xb   : > { %p643_p6 = scmp.ge.s32.totalorder %s886_s23, 2  ;;  %s889_s7 = smov 384  }
   0xc   : > { %p666_p4 = pneg %p963_p3  ;;  %s890_s8 = smov 24  }
   0xd   : > { %s640_s9 = sadd.s32 4294967294, %s886_s23   ;;  %s34_s10 = sadd.s32 1, %s882_s22 }
   0xe   : > { %p667_p5 = pnand %p666_p4, %p955_p1  ;;  %s109_s11 = sadd.s32 1, %s874_s20 }
   0xf   : > { %p36_p7 = scmp.ge.s32.totalorder %s34_s10, 2  ;;  %p116_p8 = scmp.ne.s32.totalorder %s874_s20, %s870_s19 }
  0x10   : > { %669 = dma.hbm_to_vmem [thread:$0]  (!%p667_p5), %s201_s28, 1536, %s203_s6, [#allocation4], %s889_s7, %s889_s7, %s890_s8  }
  0x11   : > { %p117_p9 = scmp.eq.s32.totalorder %s886_s23, 0  ;;  %p122_p10 = scmp.ne.s32.totalorder %s870_s19, %s866_s18 }
  0x12   : > { %s1106_s10 = smov (%p36_p7, %s34_s10), 0  ;;  %p176_p13 = scmp.eq.s32.totalorder %s639_s24, 1 }
  0x13   : > { %p982_p11 = por %p117_p9, %p116_p8  ;;  %p988_p12 = por %p955_p1, %p122_p10 }
  0x14   : > { %s106_s14 = ssub.s32 %s882_s22, %s1106_s10  ;;  %p182_p2 = scmp.eq.s32.totalorder %s640_s9, 1 }
  0x15   : > { %p107_p0 = scmp.eq.s32.totalorder %s106_s14, 0  ;;  %p994_p4 = por %p176_p13, %p116_p8 }
  0x16   : > { %p679_p5 = scmp.lt.s32.totalorder %s886_s23, 2  ;;  %p1002_p7 = por %p182_p2, %p122_p10 }
  0x17   : > { %s1000_s16 = scalar_select %p107_p0, %s874_s20, %s109_s11  }
  0x18   : > { %s226_s26 = sand.u32 1, %s874_s20   ;;  %s232_s30 = scalar_lea.hbm %s1091_s3, %s882_s22 }
  0x19   : > { %s229_s6 = scalar_lea.vmem [#allocation6], %s226_s26  ;;  %s234_s7 = sshll.u32 %s232_s30, 4  ;;  %s235_s7 = int_to_ptr.hbm [resolvable:$true] %s234_s7 }
  0x1a   : > { %s236_s24 = sshll.u32 %s229_s6, 4  ;;  %p671_p8 = pnand %p679_p5, %p982_p11  ;;  %s237_s24 = int_to_ptr.vmem [resolvable:$true] %s236_s24 }
  0x1b   : > { %s227_s8 = scalar_lea.sflag [#allocation7], %s226_s26  ;;  %255 = sbr.rel (%p963_p3) target bundleno = 699 (0x2bb), region = 40 }
  0x1c   : > { %673 = dma.hbm_to_vmem [thread:$0]  (!%p671_p8), %s235_s7, 16, %s237_s24, %s227_s8  }
  0x20   : > { %853 = dma.done.wait (%p955_p1), [#allocation4], 1536  }
  0x21   : > { %855 = vsyncadd (%p955_p1), [#allocation4], 4294965760  ;;  %s1020_s9 = sand.u32 1, %s870_s19  }
  0x22   : > { %s263_s11 = scalar_lea.sflag [#allocation7], %s1020_s9  ;;  %s265_s12 = scalar_lea.vmem [#allocation6], %s1020_s9 }
  0x23   : > { %857 = dma.done.wait (%p988_p12), %s263_s11, 16  }
  0x24   : > { %859 = vsyncadd (%p988_p12), %s263_s11, 4294967280  ;;  %p303_p3 = scmp.lt.s32.totalorder %s878_s21, 1  ;;  %v329_v0 = vld [vmem:[#allocation3 + $0x50] sm:$0xff]  ;;  %v326_v1 = vld [vmem:[#allocation3 + $0x38] sm:$0xff]  ;;  %vm339_vm0 = vcmask 261120   ;;  %v891_v10 = vmov 0   ;;  %v448_v27 = vlaneseq }
  0x25   : > { %v328_v2 = vld [vmem:[#allocation3 + $0x48] sm:$0xff]  ;;  %375 = vmatpush.msra.mxu1 %v329_v0  ;;  %v325_v3 = vld [vmem:[#allocation3 + $0x30] sm:$0xff]  ;;  %v323_v4 = vld [vmem:[#allocation3 + $0x20] sm:$0xff]  ;;  %735 = vset.pattern.permute.xlu0 %v891_v10  ;;  %vm892_vm2 = vmmov 1   ;;  %vm470_vm14 = vcmask 64512   ;;  %s646_s7 = sshll.u32 %s1020_s9, 3 }
  0x26   : > { %s304_s29 = scalar_select %p303_p3, %s878_s21, 1  ;;  %355 = vmatpush.msra.mxu0 %v328_v2  ;;  %v322_v5 = vld [vmem:[#allocation3 + $0x18] sm:$0xff]  ;;  %v320_v6 = vld [vmem:[#allocation3 + $0x8] sm:$0xff]  ;;  %v319_v7 = vld [vmem:[#allocation3] sm:$0xff]  ;;  %v449_v30 = vshrl.u32 %v448_v27, 7  ;;  %v453_v31 = vand.u32 127, %v448_v27 }
  0x27   : > { %376 = vmatpush.msra.mxu1 %v326_v1  ;;  %v331_v13 = vld [vmem:[%s1090_s2] sm:$0x7]  ;;  %v330_v20 = vld [vmem:[#allocation3 + $0x58] sm:$0xff]  ;;  %v324_v22 = vld [vmem:[#allocation3 + $0x28] sm:$0xff]  ;;  %s655_s8 = sshll.u32 %s878_s21, 3  ;;  %s820_s6 = scalar_lea.hbm %s1093_s5, 16 }
  0x28   : > { %s647_s14 = sshll.u32 %s304_s29, 3  ;;  %356 = vmatpush.msra.mxu0 %v325_v3  ;;  %v334_v14 = vperm.slane %v331_v13, 1  ;;  %v333_v15 = vperm.slane %v331_v13, 0  ;;  %v327_v21 = vld [vmem:[#allocation3 + $0x40] sm:$0xff]  ;;  %395 = vmatpush.msra.mxu2 %v330_v20  ;;  %v321_v23 = vld [vmem:[#allocation3 + $0x10] sm:$0xff]  ;;  %vm454_vm8 = vcmp.ge.s32.totalorder %v449_v30, %v453_v31  ;;  %v335_v38 = vperm.slane %v331_v13, 2  ;;  %s518_s29 = scalar_lea.hbm %s1093_s5, %s655_s8 }
  0x29   : > { %s306_s27 = scalar_lea.vmem %s1088_s0, %s647_s14  ;;  %377 = vmatpush.msra.mxu1 %v323_v4  ;;  %s313_s30 = scalar_lea.vmem %s1092_s4, %s647_s14  ;;  %v437_v24 = vld [vmem:[%s265_s12] sm:$0x1] }
  0x2a   : > { %357 = vmatpush.msra.mxu0 %v322_v5  ;;  %v318_v8 = vld [vmem:[%s306_s27] sm:$0xff]  ;;  %396 = vmatpush.msra.mxu2 %v327_v21  ;;  %vm438_vm4 = vcmp.gt.f32.partialorder %v437_v24, 0.5  ;;  %s302_s14 = scalar_lea.vmem [#allocation8], %s646_s7  ;;  %s522_s26 = sshll.u32 %s518_s29, 4  ;;  %s523_s26 = int_to_ptr.hbm [resolvable:$true] %s522_s26 }
  0x2b   : > { %378 = vmatpush.msra.mxu1 %v320_v6  ;;  %v435_v9 = vld [vmem:[%s313_s30] sm:$0xff]  ;;  %v444_v26 = vsel %vm438_vm4, 1, %v891_v10  ;;  %vm457_vm5 = vmxor %vm438_vm4, %vm892_vm2  ;;  %s520_s25 = sshll.u32 %s302_s14, 4  ;;  %s507_s27 = scalar_lea.sflag [#allocation5], %s1020_s9  ;;  %s521_s25 = int_to_ptr.vmem [resolvable:$true] %s520_s25 }
  0x2c   : > { %358 = vmatpush.msra.mxu0 %v319_v7  ;;  %650 = vmatmul.msk.f32.vlgmr.msra.gmra.mxu1 %vm339_vm0, %v318_v8  ;;  %vm436_vm1 = vcmp.gt.f32.partialorder %v435_v9, 0.5  ;;  %v445_v28 = vperm.slane %v444_v26, 0  ;;  %v463_v29 = vsel %vm457_vm5, 1, %v891_v10  ;;  %s814_s13 = sshra.s32 %s523_s26, 4  ;;  %s815_s13 = int_to_ptr.hbm [resolvable:$true] %s814_s13 }
  0x2d   : > { %649 = vmatmul.msk.f32.vlgmr.msra.gmra.mxu0 %vm339_vm0, %v318_v8  ;;  %v439_v11 = vsel %vm436_vm1, 1, %v891_v10  ;;  %vm456_vm3 = vmxor %vm436_vm1, %vm892_vm2  ;;  %397 = vmatpush.msra.mxu2 %v324_v22  ;;  %v464_v32 = vperm.slane %v463_v29, 0  ;;  %s816_s28 = scalar_lea.hbm %s815_s13, 8  ;;  %p821_p11 = scmp.lt.s32.totalorder %s815_s13, %s1093_s5 }
  0x2e   : > { %441 = vperm.xlu0 %735, %v439_v11   ;;  %v458_v12 = vsel %vm456_vm3, 1, %v891_v10  ;;  %vm446_vm6 = vcmp.eq.s32.totalorder %v445_v28, 1  ;;  %p817_p1 = scmp.ne.s32.totalorder %s815_s13, %s816_s28  ;;  %p822_p12 = scmp.lt.s32.totalorder %s820_s6, %s816_s28 }
  0x2f   : > { %398 = vmatpush.msra.mxu2 %v321_v23  ;;  %vm465_vm10 = vcmp.eq.s32.totalorder %v464_v32, 1 }
  0x30   : > { %651 = vmatmul.msk.f32.vlgmr.msra.gmra.mxu2 %vm339_vm0, %v318_v8  ;;  %p818_p9 = pnand %p817_p1, %p994_p4  ;;  %p823_p13 = por %p822_p12, %p821_p11 }
  0x32   : > { %p819_p10 = pneg %p818_p9 }
  0x34   : > { %p824_p0 = pnand %p823_p13, %p819_p10 }
  0x36   : > { %460 = vperm.xlu0 %735, %v458_v12  }
  0xa0   : > { %v442_v25 = vpop.permute.xlu0 %441 }
  0xa1   : > { %vm443_vm7 = vcmp.eq.s32.totalorder %v442_v25, 1 }
  0xa2   : > { %vm447_vm9 = vmand %vm443_vm7, %vm446_vm6 }
  0xa3   : > { %vm455_vm12 = vmand %vm447_vm9, %vm454_vm8 }
  0xa8   : > { %v461_v33 = vpop.permute.xlu0 %460 }
  0xa9   : > { %v380_v16 = vpop.f32.mrf.mxu1  ;;  %vm462_vm11 = vcmp.eq.s32.totalorder %v461_v33, 1 }
  0xaa   : > { %v360_v17 = vpop.f32.mrf.mxu0  ;;  %v381_v18 = vadd.f32 %v380_v16, %v334_v14  ;;  %vm466_vm13 = vmand %vm462_vm11, %vm465_vm10 }
  0xab   : > { %v361_v19 = vadd.f32 %v360_v17, %v333_v15  ;;  %vm467_vm15 = vmor %vm455_vm12, %vm466_vm13 }
  0xac   : > { %430 = vmatpush.xpose.msra.mxu3 %v381_v18 }
  0xaf   : > { %431 = vmatmul.f32.vlgmr.msra.gmra.mxu3 %v361_v19 }
  0xb3   : > { %v400_v39 = vpop.f32.mrf.mxu2 }
  0xb4   : > { %v401_v40 = vadd.f32 %v400_v39, %v335_v38 }
  0xb6   : > { %500 = vmatpush.msrb.mxu3 %v401_v40 }
 0x132   : > { %v432_v34 = vpop.f32.mrf.mxu3 }
 0x133   : > { %v652_v35 = vadd.f32 -100000.0, %v432_v34 }
 0x135   : > { %v469_v36 = vsel %vm467_vm15, %v432_v34, %v652_v35 }
 0x136   : > { %v471_v37 = vsel %vm470_vm14, %v469_v36, -inf }
 0x137   : > { %472 = vmax.xlane.f32.xlu1 %v471_v37 }
 0x1aa   : > { %v473_v41 = vpop.xlane.xlu1 %472 }
 0x1ab   : > { %v474_v42 = vsub.f32 %v469_v36, %v473_v41 }
 0x1ad   : > { %v475_v43 = vmul.f32 1.442695, %v474_v42 }
 0x1af   : > { %736 = vpow2.f32 %v475_v43 }
 0x1b5   : > { %v737_v44 = vpop.eup %736 }
 0x1b6   : > { %v477_v45 = vsel %vm470_vm14, %v737_v44, 0.0 }
 0x1b7   : > { %478 = vadd.xlane.f32.xlu1 %v477_v45 }
 0x22a   : > { %v479_v46 = vpop.xlane.xlu1 %478 }
 0x22b   : > { %738 = vrcp.f32 %v479_v46 }
 0x231   : > { %v739_v47 = vpop.eup %738 }
 0x232   : > { %v481_v48 = vmul.f32 %v739_v47, %v737_v44 }
 0x234   : > { %653 = vmatmul.msk.f32.vlgmr.msrb.gmra.mxu3 %vm470_vm14, %v481_v48 }
 0x2b7   : > { %v502_v49 = vpop.f32.mrf.mxu3 }
 0x2b8   : > { %505 = vst [vmem:[%s302_s14] sm:$0xff] %v502_v49 }
 0x2b9   : > { %827 = shalt.err (!%p824_p0)
}
 0x2ba   : > { %664 = dma.vmem_to_hbm [thread:$0]  (%p994_p4), %s521_s25, 128, %s523_s26, %s507_s27  }
 0x2bb PF: > { %s534_s9 = sand.u32 1, %s866_s18   ;;  %p675_p2 = pnand %p643_p6, %p1002_p7 }
 0x2bc   : > { %s535_s8 = scalar_lea.sflag [#allocation5], %s534_s9 }
 0x2bd   : > { %p676_p5 = pneg %p675_p2 }
 0x2bf   : > { %861 = dma.done.wait (%p676_p5), %s535_s8, 128  }
 0x2c0   : > { %863 = vsyncadd (%p676_p5), %s535_s8, 4294967168  ;;  %s22_s23 = sadd.s32 1, %s886_s23   ;;  %s1100_s18 = smov %s870_s19 }
 0x2c1   : > { %p19_p8 = scmp.ge.s32.totalorder %s22_s23, 4   ;;  %s1101_s19 = smov %s874_s20 }
 0x2c2   : > { %s1102_s20 = smov %s1000_s16  ;;  %s1103_s21 = smov %s882_s22 }
 0x2c3   : > { %s1104_s22 = smov %s1106_s10  ;;  %21 = sbr.rel (!%p19_p8) target bundleno = 7 (0x7), region = 101 }
 0x2c8   :  { %541 = vsyncpa [#allocation4], 1 }
 0x2c9   :  { %543 = vsyncpa [#allocation4 + $0x1], 1 }
 0x2ca   :  { %544 = vsyncpa [#allocation7], 1 }
 0x2cb   :  { %546 = vsyncpa [#allocation7 + $0x1], 1 }
 0x2cc   :  { %547 = vsyncpa [#allocation5], 1 }
 0x2cd   :  { %549 = vsyncpa [#allocation5 + $0x1], 1 }

</bundles_post_ra>
